<compile_context>
chip_gen: v7x
topology: tpu7x:2x2x1
jax: 0.10.0
libtpu: 0.0.40
codegen_flags: <defaults>
</compile_context>

<pallas_src>
import functools

import jax
import jax.numpy as jnp
from jax import lax
from jax.experimental import pallas as pl
from jax.experimental.pallas import tpu as pltpu

LEAKY_SLOPE = 0.1
LN_EPS = 1e-5


def _round_up(n, m):
    return ((n + m - 1) // m) * m


def _cdiv(a, b):
    return -(-a // b)


def _leaky_relu(h):
    # max(h, 0.1*h) == leaky_relu(h, 0.1) for slope < 1; 2 VPU ops, no select.
    return jnp.maximum(h, LEAKY_SLOPE * h)


def _fused_layernorm(h, gamma, beta, real_n):
    """Single-pass LayerNorm over the last dim. `real_n` = un-padded width.
    Assumes padded columns of h are exactly zero (zero-padded weights/biases)."""
    inv_n = 1.0 / float(real_n)
    s = jnp.sum(h, axis=-1, keepdims=True)
    ss = jnp.sum(h * h, axis=-1, keepdims=True)
    mu = s * inv_n
    var = jnp.maximum(ss * inv_n - mu * mu, 0.0)   # clamp: guards catastrophic cancellation
    return (h - mu) * lax.rsqrt(var + LN_EPS) * gamma + beta


def protonet_kernel(x_ref,
                    w1_ref, ln1_ref,
                    w2_ref, ln2_ref,
                    protoT_ref, p2_ref,
                    out_ref, *, real_h, real_e):
    bf16 = jnp.bfloat16
    x = x_ref[...]                                   # already bf16 (cast folded into pad)

    ln1 = ln1_ref[...]                               # (3, H_pad): [bias; gamma; beta]
    ln2 = ln2_ref[...]                               # (3, E_pad): [bias; gamma; beta]

    # fc1 -> LayerNorm -> LeakyReLU(0.1)   (bf16 operands, f32 accumulate)
    h = jnp.dot(x, w1_ref[...], preferred_element_type=jnp.float32) + ln1[0:1, :]
    h = _fused_layernorm(h, ln1[1:2, :], ln1[2:3, :], real_h)
    h = _leaky_relu(h)

    # Dropout: identity (module evaluated in inference mode).
    # TODO(synk): training-mode dropout (random mask + 1/(1-p) scaling) not emitted.

    # fc2 -> LayerNorm -> LeakyReLU(0.1)
    e = jnp.dot(h.astype(bf16), w2_ref[...], preferred_element_type=jnp.float32) + ln2[0:1, :]
    e = _fused_layernorm(e, ln2[1:2, :], ln2[2:3, :], real_e)
    e = _leaky_relu(e)

    # logits = -||e - p||^2 = -(||e||^2 + ||p||^2 - 2 e.p)
    # e2 uses the same bf16-rounded e as the cross matmul (consistent rounding).
    e_bf = e.astype(bf16)
    e_f = e_bf.astype(jnp.float32)
    e2 = jnp.sum(e_f * e_f, axis=-1, keepdims=True)                   # [TB, 1] f32
    cross = jnp.dot(e_bf, protoT_ref[...],                            # [TB, C_pad] f32
                    preferred_element_type=jnp.float32)
    out_ref[...] = (-(e2 + p2_ref[...] - 2.0 * cross)).astype(out_ref.dtype)


def _pad2(a, rows, cols):
    return jnp.pad(a, ((0, rows - a.shape[0]), (0, cols - a.shape[1])))


def _pad_row(a, cols):
    return jnp.pad(a, ((0, 0), (0, cols - a.shape[1])))


_HAS_BUFFERED = hasattr(pl, "Buffered")


def _const_spec(shape):
    """VMEM-resident (constant index map) block; single-buffered when supported."""
    index_map = lambda i: (0, 0)
    if _HAS_BUFFERED:
        try:
            return pl.BlockSpec(shape, index_map, pipeline_mode=pl.Buffered(1))
        except TypeError:
            pass
    return pl.BlockSpec(shape, index_map)


def prepare_params(params):
    """One-time weight preprocessing (hoisted out of the per-call forward).

    Returns (prepped_arrays, real_dims) where real_dims = (in_dim, H, E, C) are
    static Python ints.

    Zero-padding invariant (do not change): padded weight COLUMNS, biases, gammas
    and betas are exactly 0, so padded activation columns stay exactly 0 through
    fc -> LN -> LeakyReLU; this is what makes the mask-free LayerNorm correct.
    """
    in_dim, H = params["w1"].shape
    E = params["w2"].shape[1]
    C = params["prototypes"].shape[0]

    H_pad = _round_up(H, 128)
    E_pad = _round_up(E, 128)
    C_pad = _round_up(C, 128)
    # Pad the contraction dim of fc1 only when it is large AND misaligned; for a
    # tiny in_dim padding would just inflate x DMA for a negligible matmul.
    in_pad = _round_up(in_dim, 128) if (in_dim > 128 and in_dim % 128 != 0) else in_dim

    bf16 = jnp.bfloat16
    w1 = _pad2(params["w1"], in_pad, H_pad).astype(bf16)              # [in_pad, H_pad] bf16
    w2 = _pad2(params["w2"], H_pad, E_pad).astype(bf16)               # [H_pad, E_pad] bf16

    # Pack per-layer row vectors into one (3, N) block each: row0=bias, 1=gamma, 2=beta.
    ln1 = jnp.concatenate([_pad_row(params["b1"], H_pad),
                           _pad_row(params["g1"], H_pad),
                           _pad_row(params["be1"], H_pad)], axis=0)   # [3, H_pad] f32
    ln2 = jnp.concatenate([_pad_row(params["b2"], E_pad),
                           _pad_row(params["g2"], E_pad),
                           _pad_row(params["be2"], E_pad)], axis=0)   # [3, E_pad] f32

    proto_bf = _pad2(params["prototypes"], C_pad, E_pad).astype(bf16)  # [C_pad, E_pad] bf16
    protoT = proto_bf.T                                                # [E_pad, C_pad] bf16
    p_f = proto_bf.astype(jnp.float32)
    p2 = jnp.sum(p_f * p_f, axis=1)[None, :]                           # [1, C_pad] f32 (bf16-rounded protos)

    prepped = dict(w1=w1, ln1=ln1, w2=w2, ln2=ln2, protoT=protoT, p2=p2)
    return prepped, (in_dim, H, E, C)


def protonet_forward(x, prepped, real_dims, *, tile_b=512, out_dtype=jnp.float32):
    """x: [B, input_dim] float32. prepped/real_dims: from prepare_params()."""
    in_dim, H, E, C = real_dims
    w1, ln1, w2, ln2, protoT, p2 = (prepped["w1"], prepped["ln1"], prepped["w2"],
                                    prepped["ln2"], prepped["protoT"], prepped["p2"])
    in_pad, H_pad = w1.shape
    E_pad = w2.shape[1]
    C_pad = protoT.shape[1]

    B = x.shape[0]
    assert x.shape[1] == in_dim

    # Batch tile: big tiles for DMA amortization, but >= 2 grid steps whenever
    # possible so dimension_semantics=("parallel",) can use both v7x TensorCores.
    TB = min(tile_b, _round_up(_cdiv(B, 2), 8))
    B_pad = _round_up(B, TB)
    grid = (B_pad // TB,)

    # Pad + cast x in one shot (kernel streams bf16 x, no in-kernel cast).
    xp = jnp.pad(x.astype(jnp.bfloat16), ((0, B_pad - B), (0, in_pad - in_dim)))

    # --- VMEM budget (single-buffered weights, double-buffered x/out tiles) ---
    out_bytes = jnp.dtype(out_dtype).itemsize
    weight_bytes = (in_pad * H_pad + H_pad * E_pad + E_pad * C_pad) * 2      # bf16, x1 buffer
    small_bytes = (3 * H_pad + 3 * E_pad + C_pad) * 4                        # LN packs + p2
    stream_bytes = 2 * TB * in_pad * 2 + 2 * TB * C_pad * out_bytes          # x + out, x2 buffers
    live_bytes = 2 * TB * (H_pad + E_pad + C_pad) * 4                        # f32 intermediates (margin)
    vmem_estimate = weight_bytes + small_bytes + stream_bytes + live_bytes
    if weight_bytes > (40 << 20):
        # TODO(synk): K/N-tiled grid with a VMEM accumulator for weights that do not
        # fit VMEM-resident (v7x has only 64 MiB physical VMEM per TensorCore).
        raise NotImplementedError("ProtoNet weights exceed the resident-VMEM budget")
    vmem_limit = min(max(int(1.5 * vmem_estimate) + (2 << 20), 32 << 20), 64 << 20)

    kernel = functools.partial(protonet_kernel, real_h=H, real_e=E)

    out = pl.pallas_call(
        kernel,
        out_shape=jax.ShapeDtypeStruct((B_pad, C_pad), out_dtype),
        grid=grid,
        in_specs=[
            pl.BlockSpec((TB, in_pad), lambda i: (i, 0)),     # x tile (streamed, double-buffered)
            _const_spec((in_pad, H_pad)),                     # w1        (resident)
            _const_spec((3, H_pad)),                          # b1/g1/be1 (resident)
            _const_spec((H_pad, E_pad)),                      # w2        (resident)
            _const_spec((3, E_pad)),                          # b2/g2/be2 (resident)
            _const_spec((E_pad, C_pad)),                      # prototypes^T (resident)
            _const_spec((1, C_pad)),                          # ||p||^2   (resident)
        ],
        out_specs=pl.BlockSpec((TB, C_pad), lambda i: (i, 0)),  # lane-dense (>=128)
        compiler_params=pltpu.CompilerParams(
            dimension_semantics=("parallel",),                # shard batch across v7x TCs
            vmem_limit_bytes=vmem_limit,
        ),
    )(xp, w1, ln1, w2, ln2, protoT, p2)
    return out[:B, :C].astype(jnp.float32)


def init_params(key, input_dim, hidden_dim, embed_dim, output_dim):
    """Deterministic synthetic init mirroring the PyTorch module."""
    ks = jax.random.split(key, 3)

    def lin(k, fan_in, fan_out):
        bound = 1.0 / jnp.sqrt(fan_in)
        kw, kb = jax.random.split(k)
        w = jax.random.uniform(kw, (fan_in, fan_out), jnp.float32, -bound, bound)
        b = jax.random.uniform(kb, (1, fan_out), jnp.float32, -bound, bound)
        return w, b

    w1, b1 = lin(ks[0], input_dim, hidden_dim)
    w2, b2 = lin(ks[1], hidden_dim, embed_dim)
    prototypes = jax.random.normal(ks[2], (output_dim, embed_dim), jnp.float32)  # N(0,1)
    g1 = jnp.ones((1, hidden_dim), jnp.float32)
    be1 = jnp.zeros((1, hidden_dim), jnp.float32)
    g2 = jnp.ones((1, embed_dim), jnp.float32)
    be2 = jnp.zeros((1, embed_dim), jnp.float32)
    return dict(w1=w1, b1=b1, g1=g1, be1=be1,
                w2=w2, b2=b2, g2=g2, be2=be2,
                prototypes=prototypes)


def reference_forward_matched(x, p):
    """Pure-JAX reference using the SAME numerics as the kernel (bf16 matmul operands,
    f32 accumulate, fused LN with clamp, bf16-rounded distance expansion)."""
    bf16 = jnp.bfloat16
    h = jnp.dot(x.astype(bf16), p["w1"].astype(bf16),
                preferred_element_type=jnp.float32) + p["b1"]
    h = _fused_layernorm(h, p["g1"], p["be1"], h.shape[-1])
    h = _leaky_relu(h)
    e = jnp.dot(h.astype(bf16), p["w2"].astype(bf16),
                preferred_element_type=jnp.float32) + p["b2"]
    e = _fused_layernorm(e, p["g2"], p["be2"], e.shape[-1])
    e = _leaky_relu(e)
    e_bf = e.astype(bf16)
    e_f = e_bf.astype(jnp.float32)
    e2 = jnp.sum(e_f * e_f, axis=-1, keepdims=True)
    proto_bf = p["prototypes"].astype(bf16)
    p_f = proto_bf.astype(jnp.float32)
    p2 = jnp.sum(p_f * p_f, axis=1)[None, :]
    cross = jnp.dot(e_bf, proto_bf.T, preferred_element_type=jnp.float32)
    return -(e2 + p2 - 2.0 * cross)


def reference_forward_f32(x, p):
    """Pure f32 reference mimicking the PyTorch forward literally — loose-tolerance check."""
    def ln(h, g, b):
        mu = jnp.mean(h, axis=-1, keepdims=True)
        var = jnp.mean((h - mu) ** 2, axis=-1, keepdims=True)
        return (h - mu) * lax.rsqrt(var + LN_EPS) * g + b

    def lrelu(h):
        return jnp.where(h > 0, h, LEAKY_SLOPE * h)

    h = x @ p["w1"] + p["b1"]
    h = lrelu(ln(h, p["g1"], p["be1"]))
    e = h @ p["w2"] + p["b2"]
    e = lrelu(ln(e, p["g2"], p["be2"]))
    diff = e[:, None, :] - p["prototypes"][None, :, :]
    return -jnp.sum(diff * diff, axis=2)


if __name__ == "__main__":
    input_dim, hidden_dim, embed_dim, output_dim = 32, 64, 64, 16
    batch = 8

    key = jax.random.PRNGKey(0)
    kx, kp = jax.random.split(key)
    x = jax.random.normal(kx, (batch, input_dim), dtype=jnp.float32)
    params = init_params(kp, input_dim, hidden_dim, embed_dim, output_dim)

    # One-time weight prep (hoisted out of the jitted forward).
    prepped, real_dims = prepare_params(params)

    fwd = jax.jit(protonet_forward, static_argnames=("real_dims",))
    out = jax.block_until_ready(fwd(x, prepped, real_dims))
    assert out.shape == (batch, output_dim)

    # Tight check vs numerics-matched reference.
    ref_m = reference_forward_matched(x, params)
    assert jnp.allclose(out, ref_m, atol=1e-2, rtol=1e-3), "mismatch vs matched reference"

    # Loose sanity check vs pure-f32 PyTorch-style reference (bf16 matmul tolerance).
    ref_f = reference_forward_f32(x, params)
    assert jnp.allclose(out, ref_f, atol=0.5, rtol=0.05), "mismatch vs f32 reference"

    print("KERNEL_OK")
</pallas_src>

<mosaic_0001>
module attributes {stable_mosaic.version = 11 : i64} {
  func.func @protonet_kernel(%arg0: i32, %arg1: memref<8x32xbf16, #tpu.memory_space<vmem>>, %arg2: memref<32x128xbf16, #tpu.memory_space<vmem>>, %arg3: memref<3x128xf32, #tpu.memory_space<vmem>>, %arg4: memref<128x128xbf16, #tpu.memory_space<vmem>>, %arg5: memref<3x128xf32, #tpu.memory_space<vmem>>, %arg6: memref<128x128xbf16, #tpu.memory_space<vmem>>, %arg7: memref<1x128xf32, #tpu.memory_space<vmem>>, %arg8: memref<8x128xf32, #tpu.memory_space<vmem>>) attributes {dimension_semantics = [#tpu.dimension_semantics<parallel>], iteration_bounds = array<i64: 1>, scalar_prefetch = 0 : i64, scratch_operands = 0 : i64, tpu.core_type = #tpu.core_type<tc>, window_params = [{transform_indices = @transform_0, window_bounds = array<i64: 8, 32>}, {pipeline_mode = #tpu.pipeline_mode<synchronous>, transform_indices = @transform_1, window_bounds = array<i64: 32, 128>}, {pipeline_mode = #tpu.pipeline_mode<synchronous>, transform_indices = @transform_2, window_bounds = array<i64: 3, 128>}, {pipeline_mode = #tpu.pipeline_mode<synchronous>, transform_indices = @transform_3, window_bounds = array<i64: 128, 128>}, {pipeline_mode = #tpu.pipeline_mode<synchronous>, transform_indices = @transform_4, window_bounds = array<i64: 3, 128>}, {pipeline_mode = #tpu.pipeline_mode<synchronous>, transform_indices = @transform_5, window_bounds = array<i64: 128, 128>}, {pipeline_mode = #tpu.pipeline_mode<synchronous>, transform_indices = @transform_6, window_bounds = array<i64: 1, 128>}, {transform_indices = @transform_7, window_bounds = array<i64: 8, 128>}]} {
    %c0 = arith.constant 0 : index
    %c0_0 = arith.constant 0 : index
    %0 = vector.load %arg1[%c0, %c0_0] : memref<8x32xbf16, #tpu.memory_space<vmem>>, vector<8x32xbf16>
    %c0_1 = arith.constant 0 : index
    %c0_2 = arith.constant 0 : index
    %1 = vector.load %arg3[%c0_1, %c0_2] : memref<3x128xf32, #tpu.memory_space<vmem>>, vector<3x128xf32>
    %c0_3 = arith.constant 0 : index
    %c0_4 = arith.constant 0 : index
    %2 = vector.load %arg5[%c0_3, %c0_4] : memref<3x128xf32, #tpu.memory_space<vmem>>, vector<3x128xf32>
    %c0_5 = arith.constant 0 : index
    %c0_6 = arith.constant 0 : index
    %3 = vector.load %arg2[%c0_5, %c0_6] : memref<32x128xbf16, #tpu.memory_space<vmem>>, vector<32x128xbf16>
    %cst = arith.constant dense<0.000000e+00> : vector<8x128xf32>
    %4 = tpu.matmul %0, %3, %cst {dimension_numbers = #tpu.dot_dimension_numbers<[1], [0], [0], [1], [0, 0, 1, 1], [], []>} : vector<8x32xbf16>, vector<32x128xbf16>, vector<8x128xf32> -> vector<8x128xf32>
    %5 = vector.extract_strided_slice %1 {offsets = [0, 0], sizes = [1, 128], strides = [1, 1]} : vector<3x128xf32> to vector<1x128xf32>
    %6 = vector.broadcast %5 : vector<1x128xf32> to vector<8x128xf32>
    %7 = arith.addf %4, %6 : vector<8x128xf32>
    %8 = vector.extract_strided_slice %1 {offsets = [1, 0], sizes = [1, 128], strides = [1, 1]} : vector<3x128xf32> to vector<1x128xf32>
    %9 = vector.extract_strided_slice %1 {offsets = [2, 0], sizes = [1, 128], strides = [1, 1]} : vector<3x128xf32> to vector<1x128xf32>
    %cst_7 = arith.constant dense<0.000000e+00> : vector<8xf32>
    %10 = vector.multi_reduction <add>, %7, %cst_7 [1] : vector<8x128xf32> to vector<8xf32>
    %11 = vector.shape_cast %10 : vector<8xf32> to vector<8x1xf32>
    %12 = arith.mulf %7, %7 : vector<8x128xf32>
    %cst_8 = arith.constant dense<0.000000e+00> : vector<8xf32>
    %13 = vector.multi_reduction <add>, %12, %cst_8 [1] : vector<8x128xf32> to vector<8xf32>
    %14 = vector.shape_cast %13 : vector<8xf32> to vector<8x1xf32>
    %cst_9 = arith.constant 1.562500e-02 : f32
    %15 = vector.broadcast %cst_9 : f32 to vector<8x1xf32>
    %16 = arith.mulf %11, %15 : vector<8x1xf32>
    %cst_10 = arith.constant 1.562500e-02 : f32
    %17 = vector.broadcast %cst_10 : f32 to vector<8x1xf32>
    %18 = arith.mulf %14, %17 : vector<8x1xf32>
    %19 = arith.mulf %16, %16 : vector<8x1xf32>
    %20 = arith.subf %18, %19 : vector<8x1xf32>
    %cst_11 = arith.constant 0.000000e+00 : f32
    %21 = vector.broadcast %cst_11 : f32 to vector<8x1xf32>
    %22 = arith.maximumf %20, %21 : vector<8x1xf32>
    %23 = vector.broadcast %16 : vector<8x1xf32> to vector<8x128xf32>
    %24 = arith.subf %7, %23 : vector<8x128xf32>
    %cst_12 = arith.constant 9.99999974E-6 : f32
    %25 = vector.broadcast %cst_12 : f32 to vector<8x1xf32>
    %26 = arith.addf %22, %25 : vector<8x1xf32>
    %27 = math.rsqrt %26 : vector<8x1xf32>
    %28 = vector.broadcast %27 : vector<8x1xf32> to vector<8x128xf32>
    %29 = arith.mulf %24, %28 : vector<8x128xf32>
    %30 = vector.broadcast %8 : vector<1x128xf32> to vector<8x128xf32>
    %31 = arith.mulf %29, %30 : vector<8x128xf32>
    %32 = vector.broadcast %9 : vector<1x128xf32> to vector<8x128xf32>
    %33 = arith.addf %31, %32 : vector<8x128xf32>
    %cst_13 = arith.constant 1.000000e-01 : f32
    %34 = vector.broadcast %cst_13 : f32 to vector<8x128xf32>
    %35 = arith.mulf %34, %33 : vector<8x128xf32>
    %36 = arith.maximumf %33, %35 : vector<8x128xf32>
    %37 = arith.truncf %36 : vector<8x128xf32> to vector<8x128xbf16>
    %c0_14 = arith.constant 0 : index
    %c0_15 = arith.constant 0 : index
    %38 = vector.load %arg4[%c0_14, %c0_15] : memref<128x128xbf16, #tpu.memory_space<vmem>>, vector<128x128xbf16>
    %cst_16 = arith.constant dense<0.000000e+00> : vector<8x128xf32>
    %39 = tpu.matmul %37, %38, %cst_16 {dimension_numbers = #tpu.dot_dimension_numbers<[1], [0], [0], [1], [0, 0, 1, 1], [], []>} : vector<8x128xbf16>, vector<128x128xbf16>, vector<8x128xf32> -> vector<8x128xf32>
    %40 = vector.extract_strided_slice %2 {offsets = [0, 0], sizes = [1, 128], strides = [1, 1]} : vector<3x128xf32> to vector<1x128xf32>
    %41 = vector.broadcast %40 : vector<1x128xf32> to vector<8x128xf32>
    %42 = arith.addf %39, %41 : vector<8x128xf32>
    %43 = vector.extract_strided_slice %2 {offsets = [1, 0], sizes = [1, 128], strides = [1, 1]} : vector<3x128xf32> to vector<1x128xf32>
    %44 = vector.extract_strided_slice %2 {offsets = [2, 0], sizes = [1, 128], strides = [1, 1]} : vector<3x128xf32> to vector<1x128xf32>
    %cst_17 = arith.constant dense<0.000000e+00> : vector<8xf32>
    %45 = vector.multi_reduction <add>, %42, %cst_17 [1] : vector<8x128xf32> to vector<8xf32>
    %46 = vector.shape_cast %45 : vector<8xf32> to vector<8x1xf32>
    %47 = arith.mulf %42, %42 : vector<8x128xf32>
    %cst_18 = arith.constant dense<0.000000e+00> : vector<8xf32>
    %48 = vector.multi_reduction <add>, %47, %cst_18 [1] : vector<8x128xf32> to vector<8xf32>
    %49 = vector.shape_cast %48 : vector<8xf32> to vector<8x1xf32>
    %cst_19 = arith.constant 1.562500e-02 : f32
    %50 = vector.broadcast %cst_19 : f32 to vector<8x1xf32>
    %51 = arith.mulf %46, %50 : vector<8x1xf32>
    %cst_20 = arith.constant 1.562500e-02 : f32
    %52 = vector.broadcast %cst_20 : f32 to vector<8x1xf32>
    %53 = arith.mulf %49, %52 : vector<8x1xf32>
    %54 = arith.mulf %51, %51 : vector<8x1xf32>
    %55 = arith.subf %53, %54 : vector<8x1xf32>
    %cst_21 = arith.constant 0.000000e+00 : f32
    %56 = vector.broadcast %cst_21 : f32 to vector<8x1xf32>
    %57 = arith.maximumf %55, %56 : vector<8x1xf32>
    %58 = vector.broadcast %51 : vector<8x1xf32> to vector<8x128xf32>
    %59 = arith.subf %42, %58 : vector<8x128xf32>
    %cst_22 = arith.constant 9.99999974E-6 : f32
    %60 = vector.broadcast %cst_22 : f32 to vector<8x1xf32>
    %61 = arith.addf %57, %60 : vector<8x1xf32>
    %62 = math.rsqrt %61 : vector<8x1xf32>
    %63 = vector.broadcast %62 : vector<8x1xf32> to vector<8x128xf32>
    %64 = arith.mulf %59, %63 : vector<8x128xf32>
    %65 = vector.broadcast %43 : vector<1x128xf32> to vector<8x128xf32>
    %66 = arith.mulf %64, %65 : vector<8x128xf32>
    %67 = vector.broadcast %44 : vector<1x128xf32> to vector<8x128xf32>
    %68 = arith.addf %66, %67 : vector<8x128xf32>
    %cst_23 = arith.constant 1.000000e-01 : f32
    %69 = vector.broadcast %cst_23 : f32 to vector<8x128xf32>
    %70 = arith.mulf %69, %68 : vector<8x128xf32>
    %71 = arith.maximumf %68, %70 : vector<8x128xf32>
    %72 = arith.truncf %71 : vector<8x128xf32> to vector<8x128xbf16>
    %73 = arith.extf %72 : vector<8x128xbf16> to vector<8x128xf32>
    %74 = arith.mulf %73, %73 : vector<8x128xf32>
    %cst_24 = arith.constant dense<0.000000e+00> : vector<8xf32>
    %75 = vector.multi_reduction <add>, %74, %cst_24 [1] : vector<8x128xf32> to vector<8xf32>
    %76 = vector.shape_cast %75 : vector<8xf32> to vector<8x1xf32>
    %c0_25 = arith.constant 0 : index
    %c0_26 = arith.constant 0 : index
    %77 = vector.load %arg6[%c0_25, %c0_26] : memref<128x128xbf16, #tpu.memory_space<vmem>>, vector<128x128xbf16>
    %cst_27 = arith.constant dense<0.000000e+00> : vector<8x128xf32>
    %78 = tpu.matmul %72, %77, %cst_27 {dimension_numbers = #tpu.dot_dimension_numbers<[1], [0], [0], [1], [0, 0, 1, 1], [], []>} : vector<8x128xbf16>, vector<128x128xbf16>, vector<8x128xf32> -> vector<8x128xf32>
    %c0_28 = arith.constant 0 : index
    %c0_29 = arith.constant 0 : index
    %79 = vector.load %arg7[%c0_28, %c0_29] : memref<1x128xf32, #tpu.memory_space<vmem>>, vector<1x128xf32>
    %80 = vector.broadcast %76 : vector<8x1xf32> to vector<8x128xf32>
    %81 = vector.broadcast %79 : vector<1x128xf32> to vector<8x128xf32>
    %82 = arith.addf %80, %81 : vector<8x128xf32>
    %cst_30 = arith.constant 2.000000e+00 : f32
    %83 = vector.broadcast %cst_30 : f32 to vector<8x128xf32>
    %84 = arith.mulf %83, %78 : vector<8x128xf32>
    %85 = arith.subf %82, %84 : vector<8x128xf32>
    %cst_31 = arith.constant 0.000000e+00 : f32
    %86 = vector.broadcast %cst_31 : f32 to vector<8x128xf32>
    %87 = arith.subf %86, %85 : vector<8x128xf32>
    %c0_32 = arith.constant 0 : index
    %c0_33 = arith.constant 0 : index
    %88 = vector.load %arg8[%c0_32, %c0_33] : memref<8x128xf32, #tpu.memory_space<vmem>>, vector<8x128xf32>
    tpu.vector_store %arg8[%c0_32, %c0_33], %87 {strides = array<i32>} : memref<8x128xf32, #tpu.memory_space<vmem>>, vector<8x128xf32>,
    return
  }
  func.func @transform_0(%arg0: i32) -> (i32, i32) {
    %c0_i32 = arith.constant 0 : i32
    %c0_i32_0 = arith.constant 0 : i32
    return %arg0, %c0_i32 : i32, i32
  }
  func.func @transform_1(%arg0: i32) -> (i32, i32) {
    %c0_i32 = arith.constant 0 : i32
    %c0_i32_0 = arith.constant 0 : i32
    %c0_i32_1 = arith.constant 0 : i32
    return %c0_i32, %c0_i32_0 : i32, i32
  }
  func.func @transform_2(%arg0: i32) -> (i32, i32) {
    %c0_i32 = arith.constant 0 : i32
    %c0_i32_0 = arith.constant 0 : i32
    %c0_i32_1 = arith.constant 0 : i32
    return %c0_i32, %c0_i32_0 : i32, i32
  }
  func.func @transform_3(%arg0: i32) -> (i32, i32) {
    %c0_i32 = arith.constant 0 : i32
    %c0_i32_0 = arith.constant 0 : i32
    %c0_i32_1 = arith.constant 0 : i32
    return %c0_i32, %c0_i32_0 : i32, i32
  }
  func.func @transform_4(%arg0: i32) -> (i32, i32) {
    %c0_i32 = arith.constant 0 : i32
    %c0_i32_0 = arith.constant 0 : i32
    %c0_i32_1 = arith.constant 0 : i32
    return %c0_i32, %c0_i32_0 : i32, i32
  }
  func.func @transform_5(%arg0: i32) -> (i32, i32) {
    %c0_i32 = arith.constant 0 : i32
    %c0_i32_0 = arith.constant 0 : i32
    %c0_i32_1 = arith.constant 0 : i32
    return %c0_i32, %c0_i32_0 : i32, i32
  }
  func.func @transform_6(%arg0: i32) -> (i32, i32) {
    %c0_i32 = arith.constant 0 : i32
    %c0_i32_0 = arith.constant 0 : i32
    %c0_i32_1 = arith.constant 0 : i32
    return %c0_i32, %c0_i32_0 : i32, i32
  }
  func.func @transform_7(%arg0: i32) -> (i32, i32) {
    %c0_i32 = arith.constant 0 : i32
    %c0_i32_0 = arith.constant 0 : i32
    return %arg0, %c0_i32 : i32, i32
  }
}

</mosaic_0001>

<bundles_post_ra>
// kernel: protonet_forward.1
= control target key start
LH: loop header
LB: loop body
LE: loop exit
PB: predicated region body
PF: predicated region fallthrough
CT: control target
= control target key end

     0   :  { %12 = vsyncpa [#allocation3], 0  ;;  %s738_s0 = inlined_call_operand.vmem [shape: bf16[8,32], index: 0, kind: input, shape index: {}]   ;;  %s739_s1 = inlined_call_operand.vmem [shape: bf16[32,128], index: 1, kind: input, shape index: {}]   ;;  %s740_s2 = inlined_call_operand.vmem [shape: f32[3,128], index: 2, kind: input, shape index: {}]   ;;  %s741_s3 = inlined_call_operand.hbm [shape: bf16[128,128], index: 3, kind: input, shape index: {}]   ;;  %s742_s4 = inlined_call_operand.vmem [shape: f32[3,128], index: 4, kind: input, shape index: {}]   ;;  %s743_s5 = inlined_call_operand.hbm [shape: bf16[128,128], index: 5, kind: input, shape index: {}]   ;;  %s744_s6 = inlined_call_operand.vmem [shape: f32[1,128], index: 6, kind: input, shape index: {}]   ;;  %s745_s7 = inlined_call_operand.hbm [shape: f32[8,128], index: 7, kind: output, shape index: {}]  }
   0x1   :  { %13 = vsyncpa [#allocation6], 0 }
   0x2   :  { %14 = vsyncpa [#allocation4], 0  ;;  %s611_s24 = smov [#allocation2]   ;;  %s539_s28 = scalar_lea.hbm %s741_s3, 1024 }
   0x3   :  { %s26_s25 = sshll.u32 %s611_s24, 4  ;;  %p540_p0 = scmp.ne.s32.totalorder %s741_s3, %s539_s28  ;;  %s27_s25 = int_to_ptr.vmem [resolvable:$true] %s26_s25 }
   0x4   :  { %p543_p1 = scmp.lt.u32.totalorder %s539_s28, %s741_s3 }
   0x6   :  { %p545_p2 = pnand %p543_p1, %p540_p0 }
   0x8   :  { %548 = shalt.err (!%p545_p2)
}
   0x9   :  { %s549_s10 = scalar_lea.vmem %s27_s25, 1024  ;;  %p554_p4 = scmp.lt.s32.totalorder %s27_s25, %s27_s25 }
   0xa   :  { %p550_p3 = scmp.ne.s32.totalorder %s27_s25, %s549_s10  ;;  %p555_p5 = scmp.lt.s32.totalorder %s549_s10, %s549_s10 }
   0xc   :  { %p556_p6 = por %p555_p5, %p554_p4 }
   0xe   :  { %p557_p7 = pnand %p556_p6, %p550_p3 }
  0x10   :  { %560 = shalt.err (!%p557_p7)
}
  0x11   :  { %s612_s11 = smov 64   ;;  %s613_s12 = smov 4  }
  0x12   :  { %32 = dma.hbm_to_vmem [thread:$0]  %s741_s3, 1024, %s27_s25, [#allocation3], %s612_s11, %s612_s11, %s613_s12  }
  0x13   :  { %s614_s15 = smov [#allocation5]   ;;  %s561_s19 = scalar_lea.hbm %s743_s5, 1024 }
  0x14   :  { %s40_s16 = sshll.u32 %s614_s15, 4  ;;  %p562_p8 = scmp.ne.s32.totalorder %s743_s5, %s561_s19  ;;  %s41_s16 = int_to_ptr.vmem [resolvable:$true] %s40_s16 }
  0x15   :  { %p565_p9 = scmp.lt.u32.totalorder %s561_s19, %s743_s5 }
  0x17   :  { %p567_p10 = pnand %p565_p9, %p562_p8 }
  0x19   :  { %570 = shalt.err (!%p567_p10)
}
  0x1a   :  { %s571_s24 = scalar_lea.vmem %s41_s16, 1024  ;;  %p576_p12 = scmp.lt.s32.totalorder %s41_s16, %s41_s16 }
  0x1b   :  { %p572_p11 = scmp.ne.s32.totalorder %s41_s16, %s571_s24  ;;  %p577_p13 = scmp.lt.s32.totalorder %s571_s24, %s571_s24 }
  0x1d   :  { %p578_p0 = por %p577_p13, %p576_p12 }
  0x1f   :  { %p579_p1 = pnand %p578_p0, %p572_p11 }
  0x21   :  { %582 = shalt.err (!%p579_p1)
}
  0x22   :  { %46 = dma.hbm_to_vmem [thread:$0]  %s743_s5, 1024, %s41_s16, [#allocation6], %s612_s11, %s612_s11, %s613_s12  }
  0x23   :  { %605 = dma.done.wait [#allocation3], 1024  }
  0x24   :  { %606 = vsyncadd [#allocation3], 4294966272 }
  0x25   :  { %607 = dma.done.wait [#allocation6], 1024  }
  0x26   :  { %608 = vsyncadd [#allocation6], 4294966272  ;;  %v615_v0 = vmov 0.0   ;;  %vm616_vm0 = vmmov 0   ;;  %v517_v1 = vld [vmem:[%s739_s1] sm:$0xff]   ;;  %v518_v2 = vld [vmem:[%s739_s1 + $0x8] sm:$0xff]   ;;  %v63_v4 = vlaneseq }
  0x27   :  { %462 = vmatprep.subr.bf16.mxu0 %v615_v0  ;;  %466 = vmatprep.mubr.msk.bf16.mxu0 %vm616_vm0, %v615_v0  ;;  %vm79_vm1 = vcmask 261120   ;;  %v56_v3 = vld [vmem:[%s738_s0] sm:$0xf]  ;;  %v519_v15 = vld [vmem:[#allocation2] sm:$0xff]   ;;  %v521_v17 = vld [vmem:[#allocation2 + $0x10] sm:$0xff]   ;;  %s617_s10 = smov [#allocation7]  }
  0x28   :  { %470 = vmatprep.subr.bf16.mxu1 %v615_v0  ;;  %486 = vmatprep.mubr.msk.bf16.mxu1 %vm616_vm0, %v615_v0  ;;  %v698_v5 = vshrl.u32 %v63_v4, 7  ;;  %v57_v7 = vld [vmem:[%s740_s2] sm:$0x7]  ;;  %v522_v18 = vld [vmem:[#allocation2 + $0x18] sm:$0xff]   ;;  %v523_v19 = vld [vmem:[#allocation2 + $0x20] sm:$0xff]   ;;  %s411_s11 = sshll.u32 %s617_s10, 4  ;;  %s412_s11 = int_to_ptr.vmem [resolvable:$true] %s411_s11 }
  0x29   :  { %463 = vmatpush3.bf16.msra.mxu0 %v517_v1  ;;  %471 = vmatpush3.bf16.msra.mxu1 %v519_v15  ;;  %v520_v16 = vld [vmem:[#allocation2 + $0x8] sm:$0xff]   ;;  %v525_v21 = vld [vmem:[#allocation2 + $0x30] sm:$0xff]   ;;  %v526_v22 = vld [vmem:[#allocation2 + $0x38] sm:$0xff]   ;;  %s583_s12 = scalar_lea.vmem %s412_s11, 128  ;;  %p588_p3 = scmp.lt.s32.totalorder %s412_s11, %s412_s11 }
  0x2a   :  { %464 = vmatprep.subr.bf16.mxu0 %v615_v0  ;;  %v65_v6 = vsub.s32 0, %v698_v5  ;;  %472 = vmatprep.subr.bf16.mxu1 %v615_v0  ;;  %v524_v20 = vld [vmem:[#allocation2 + $0x28] sm:$0xff]   ;;  %v139_v31 = vsub.s32 1, %v698_v5  ;;  %v144_v32 = vsub.s32 2, %v698_v5  ;;  %v527_v51 = vld [vmem:[#allocation5] sm:$0xff]   ;;  %v529_v53 = vld [vmem:[#allocation5 + $0x10] sm:$0xff]   ;;  %p584_p2 = scmp.ne.s32.totalorder %s412_s11, %s583_s12  ;;  %p589_p4 = scmp.lt.s32.totalorder %s583_s12, %s583_s12 }
  0x2b   :  { %v58_v43 = vld [vmem:[%s742_s4] sm:$0x7]  ;;  %v530_v54 = vld [vmem:[#allocation5 + $0x18] sm:$0xff]   ;;  %v531_v55 = vld [vmem:[#allocation5 + $0x20] sm:$0xff]  }
  0x2c   :  { %v66_v8 = vrot.slane %v57_v7, %v65_v6  ;;  %v140_v33 = vrot.slane %v57_v7, %v139_v31  ;;  %v145_v36 = vrot.slane %v57_v7, %v144_v32  ;;  %v169_v44 = vrot.slane %v58_v43, %v65_v6  ;;  %v528_v52 = vld [vmem:[#allocation5 + $0x8] sm:$0xff]   ;;  %v533_v57 = vld [vmem:[#allocation5 + $0x30] sm:$0xff]   ;;  %v534_v58 = vld [vmem:[#allocation5 + $0x38] sm:$0xff]   ;;  %p590_p5 = por %p589_p4, %p588_p3 }
  0x2d   :  { %465 = vmatpush3.bf16.msra.mxu0 %v518_v2  ;;  %473 = vmatpush3.bf16.msra.mxu1 %v520_v16  ;;  %v532_v56 = vld [vmem:[#allocation5 + $0x28] sm:$0xff]   ;;  %v275_v4 = vrot.slane %v58_v43, %v139_v31  ;;  %v280_v7 = vrot.slane %v58_v43, %v144_v32 }
  0x2e   :  { %490 = vmatprep.subr.bf16.mxu0 %v615_v0  ;;  %474 = vmatprep.subr.bf16.mxu1 %v615_v0  ;;  %v440_v15 = vld [vmem:[%s744_s6] ss:$0 sm:$0xff]  ;;  %p591_p6 = pnand %p590_p5, %p584_p2 }
  0x30   :  { %467 = vmatmul.mubr.msk.bf16.vlgmr.msra.gmra.mrb[0].mxu0 %vm79_vm1, %v56_v3 }
  0x31   :  { %506 = vmatprep.mubr.msk.bf16.mxu0 %vm616_vm0, %v615_v0  ;;  %475 = vmatpush3.bf16.msra.mxu1 %v521_v17 }
  0x32   :  { %476 = vmatprep.subr.bf16.mxu1 %v615_v0  ;;  %491 = vmatpush3.bf16.msra.mxu0 %v527_v51 }
  0x33   :  { %492 = vmatprep.subr.bf16.mxu0 %v615_v0 }
  0x35   :  { %477 = vmatpush3.bf16.msra.mxu1 %v522_v18 }
  0x36   :  { %478 = vmatprep.subr.bf16.mxu1 %v615_v0  ;;  %493 = vmatpush3.bf16.msra.mxu0 %v528_v52 }
  0x37   :  { %494 = vmatprep.subr.bf16.mxu0 %v615_v0 }
  0x39   :  { %479 = vmatpush3.bf16.msra.mxu1 %v523_v19 }
  0x3a   :  { %480 = vmatprep.subr.bf16.mxu1 %v615_v0  ;;  %495 = vmatpush3.bf16.msra.mxu0 %v529_v53 }
  0x3b   :  { %496 = vmatprep.subr.bf16.mxu0 %v615_v0 }
  0x3d   :  { %481 = vmatpush3.bf16.msra.mxu1 %v524_v20 }
  0x3e   :  { %482 = vmatprep.subr.bf16.mxu1 %v615_v0  ;;  %497 = vmatpush3.bf16.msra.mxu0 %v530_v54 }
  0x3f   :  { %498 = vmatprep.subr.bf16.mxu0 %v615_v0 }
  0x41   :  { %483 = vmatpush3.bf16.msra.mxu1 %v525_v21 }
  0x42   :  { %484 = vmatprep.subr.bf16.mxu1 %v615_v0  ;;  %499 = vmatpush3.bf16.msra.mxu0 %v531_v55 }
  0x43   :  { %500 = vmatprep.subr.bf16.mxu0 %v615_v0 }
  0x45   :  { %485 = vmatpush3.bf16.msra.mxu1 %v526_v22 }
  0x46   :  { %501 = vmatpush3.bf16.msra.mxu0 %v532_v56 }
  0x47   :  { %502 = vmatprep.subr.bf16.mxu0 %v615_v0 }
  0x4a   :  { %503 = vmatpush3.bf16.msra.mxu0 %v533_v57 }
  0x4b   :  { %504 = vmatprep.subr.bf16.mxu0 %v615_v0 }
  0x4e   :  { %505 = vmatpush3.bf16.msra.mxu0 %v534_v58 }
 0x103   :  { %v117_v9 = vpop.f32.mrb[0].mxu0 }
 0x104   :  { %v118_v10 = vadd.f32 %v117_v9, %v66_v8  ;;  %v468_v11 = vpop.f32.mrb[1].mxu0 }
 0x105   :  { %v120_v12 = vpop.f32.mrb[2].mxu0 }
 0x106   :  { %123 = vadd.xlane.f32.xlu0 %v118_v10  ;;  %v469_v13 = vpop.f32.mrb[3].mxu0  ;;  %v125_v14 = vmul.f32 %v118_v10, %v118_v10 }
 0x10a   :  { %126 = vadd.xlane.f32.xlu0 %v125_v14 }
 0x193   :  { %v124_v23 = vpop.xlane.xlu0 %123 }
 0x194   :  { %v128_v24 = vmul.f32 0.015625, %v124_v23 }
 0x196   :  { %v130_v26 = vmul.f32 %v128_v24, %v128_v24  ;;  %v133_v34 = vsub.f32 %v118_v10, %v128_v24 }
 0x197   :  { %v127_v25 = vpop.xlane.xlu0 %126 }
 0x198   :  { %v129_v27 = vmul.f32 0.015625, %v127_v25 }
 0x19a   :  { %v131_v28 = vsub.f32 %v129_v27, %v130_v26 }
 0x19c   :  { %v132_v29 = vmax.f32 %v131_v28, 0.0 }
 0x19e   :  { %v134_v30 = vadd.f32 1e-05, %v132_v29 }
 0x1a0   :  { %535 = vrsqrt.f32 %v134_v30 }
 0x1aa   :  { %v536_v35 = vpop.eup %535 }
 0x1ab   :  { %v136_v37 = vmul.f32 %v536_v35, %v133_v34 }
 0x1ad   :  { %v141_v38 = vmul.f32 %v140_v33, %v136_v37 }
 0x1af   :  { %v146_v39 = vadd.f32 %v145_v36, %v141_v38 }
 0x1b1   :  { %v147_v40 = vmul.f32 0.1, %v146_v39 }
 0x1b3   :  { %v148_v41 = vmax.f32 %v146_v39, %v147_v40 }
 0x1b5   :  { %v149_v42 = vpack.c.bf16 %v148_v41, %v148_v41 }
 0x1b7   :  { %487 = vmatmul.mubr.bf16.vlgmr.msra.gmra.mrb[0].mxu1 %v149_v42 }
 0x28a   :  { %v252_v45 = vpop.f32.mrb[0].mxu1 }
 0x28b   :  { %v253_v46 = vadd.f32 %v252_v45, %v169_v44  ;;  %v488_v47 = vpop.f32.mrb[1].mxu1 }
 0x28c   :  { %v255_v48 = vpop.f32.mrb[2].mxu1 }
 0x28d   :  { %258 = vadd.xlane.f32.xlu1 %v253_v46  ;;  %v489_v49 = vpop.f32.mrb[3].mxu1  ;;  %v260_v50 = vmul.f32 %v253_v46, %v253_v46 }
 0x291   :  { %261 = vadd.xlane.f32.xlu1 %v260_v50 }
 0x31a   :  { %v259_v59 = vpop.xlane.xlu1 %258 }
 0x31b   :  { %v263_v60 = vmul.f32 0.015625, %v259_v59 }
 0x31d   :  { %v265_v62 = vmul.f32 %v263_v60, %v263_v60  ;;  %v268_v5 = vsub.f32 %v253_v46, %v263_v60 }
 0x31e   :  { %v262_v61 = vpop.xlane.xlu1 %261 }
 0x31f   :  { %v264_v63 = vmul.f32 0.015625, %v262_v61 }
 0x321   :  { %v266_v1 = vsub.f32 %v264_v63, %v265_v62 }
 0x323   :  { %v267_v2 = vmax.f32 %v266_v1, 0.0 }
 0x325   :  { %v269_v3 = vadd.f32 1e-05, %v267_v2 }
 0x327   :  { %537 = vrsqrt.f32 %v269_v3 }
 0x331   :  { %v538_v6 = vpop.eup %537 }
 0x332   :  { %v271_v8 = vmul.f32 %v538_v6, %v268_v5 }
 0x334   :  { %v276_v9 = vmul.f32 %v275_v4, %v271_v8 }
 0x336   :  { %v281_v10 = vadd.f32 %v280_v7, %v276_v9 }
 0x338   :  { %v282_v11 = vmul.f32 0.1, %v281_v10 }
 0x33a   :  { %v283_v12 = vmax.f32 %v281_v10, %v282_v11 }
 0x33c   :  { %v284_v0 = vpack.c.bf16 %v283_v12, %v283_v12 }
 0x33e   :  { %507 = vmatmul.mubr.bf16.vlgmr.msra.gmra.mrb[4].mxu0 %v284_v0  ;;  %v285_v13 = vunpack.c.l.bf16 %v284_v0 }
 0x340   :  { %v286_v14 = vmul.f32 %v285_v13, %v285_v13 }
 0x342   :  { %287 = vadd.xlane.f32.xlu0 %v286_v14 }
 0x3cf   :  { %v288_v16 = vpop.xlane.xlu0 %287 }
 0x3d0   :  { %v400_v18 = vadd.f32 %v440_v15, %v288_v16 }
 0x411   :  { %v387_v17 = vpop.f32.mrb[4].mxu0 }
 0x412   :  { %v401_v19 = vmul.f32 2.0, %v387_v17  ;;  %v508_v20 = vpop.f32.mrb[5].mxu0 }
 0x413   :  { %v390_v21 = vpop.f32.mrb[6].mxu0 }
 0x414   :  { %v402_v22 = vsub.f32 %v400_v18, %v401_v19  ;;  %v509_v23 = vpop.f32.mrb[7].mxu0 }
 0x416   :  { %v403_v24 = vsub.f32 0.0, %v402_v22 }
 0x418   :  { %404 = vst [vmem:[#allocation7] sm:$0xff] %v403_v24 }
 0x419   :  { %594 = shalt.err (!%p591_p6)
}
 0x41a   :  { %s595_s14 = scalar_lea.hbm %s745_s7, 128 }
 0x41b   :  { %p596_p7 = scmp.ne.s32.totalorder %s745_s7, %s595_s14  ;;  %p599_p8 = scmp.lt.u32.totalorder %s595_s14, %s745_s7 }
 0x41d   :  { %p601_p9 = pnand %p599_p8, %p596_p7 }
 0x41f   :  { %604 = shalt.err (!%p601_p9)
}
 0x420   :  { %414 = dma.vmem_to_hbm [thread:$0]  %s412_s11, 128, %s745_s7, [#allocation4]  }
 0x421   :  { %609 = dma.done.wait [#allocation4], 128  }
 0x422   :  { %610 = vsyncadd [#allocation4], 4294967168 }
 0x423   :  { %418 = vsyncpa [#allocation3], 1 }
 0x424   :  { %419 = vsyncpa [#allocation6], 1 }
 0x425   :  { %420 = vsyncpa [#allocation4], 1 }

</bundles_post_ra>
